<compile_context>
chip_gen: v5e
topology: v5e:2x2
jax: 0.10.0
libtpu: 0.0.40
codegen_flags: <defaults>
</compile_context>

<pallas_src>
import functools

import jax
import jax.numpy as jnp
from jax.experimental import pallas as pl
from jax.experimental.pallas import tpu as pltpu


# --------------------------------------------------------------------------- #
# Kernels
# --------------------------------------------------------------------------- #
def _stable_softplus(v):
    # max(v, 0) + log1p(exp(-|v|)) == jax.nn.softplus, numerically stable.
    return jnp.maximum(v, 0.0) + jnp.log1p(jnp.exp(-jnp.abs(v)))


def _dense_f32(x_ref, w_ref, b_ref):
    # Native dtypes straight into the MXU (bf16 at full rate); accumulate in f32
    # and run all post-matmul elementwise math in f32.
    vec = jnp.dot(x_ref[...], w_ref[...], preferred_element_type=jnp.float32)
    return vec + b_ref[...].astype(jnp.float32)


def _vae_sample_kernel(x_ref, w_ref, b_ref, noise_ref, z_ref, vec_ref):
    # x:[bm,H] w:[H,2Z] b:[1,2Z] noise:[bm,Z] -> z:[bm,Z] vec:[bm,2Z]
    vec = _dense_f32(x_ref, w_ref, b_ref)
    # Single full-width lane-dense store.  (vec is emitted in the output dtype;
    # if that is bf16, downstream KL from vec is bf16-rounded relative to the
    # f32 vec used to produce z -- same behavior as the module run in bf16.)
    vec_ref[...] = vec.astype(vec_ref.dtype)
    zsz = z_ref.shape[-1]
    # mu/var split is a register-level lane slice; free when Z % 128 == 0.
    mu = vec[:, :zsz]
    var = _stable_softplus(vec[:, zsz:])
    z_ref[...] = (mu + noise_ref[...].astype(jnp.float32) * var).astype(z_ref.dtype)


def _vae_mu_kernel(x_ref, w_ref, b_ref, mu_ref, vec_ref):
    # sampling=False path: no noise read, no softplus, no z write.
    vec = _dense_f32(x_ref, w_ref, b_ref)
    vec_ref[...] = vec.astype(vec_ref.dtype)
    mu_ref[...] = vec[:, : mu_ref.shape[-1]].astype(mu_ref.dtype)


# --------------------------------------------------------------------------- #
# Tiling / VMEM helpers
# --------------------------------------------------------------------------- #
_BUFFERED_CLS = getattr(pl, "Buffered", None)
_WEIGHT_BUFFERS = 1 if _BUFFERED_CLS is not None else 2  # buffers for invariant operands


def _invariant_spec(block_shape, index_map):
    """BlockSpec for a grid-invariant operand (weight / bias).

    A constant index_map means the block is DMA'd only once; request single
    buffering so Pallas does not allocate a useless second VMEM copy.
    """
    if _BUFFERED_CLS is not None:
        try:
            return pl.BlockSpec(block_shape, index_map,
                                pipeline_mode=_BUFFERED_CLS(1))
        except Exception:  # older BlockSpec without pipeline_mode support
            pass
    return pl.BlockSpec(block_shape, index_map)


def _tpu_vmem_capacity_bytes():
    """Physical VMEM of the current device; conservative (v7x = 64 MiB) default."""
    try:
        cap = int(pltpu.get_tpu_info().vmem_capacity_bytes)
        if cap > 0:
            return cap
    except Exception:
        pass
    return 64 << 20


def _choose_block_m(m, h, z, in_isz, out_isz, has_noise, vmem_cap):
    """Rows per grid step from a generation-aware VMEM budget.

    Accounts for double-buffered streamed blocks (x, noise, z, vec), the
    resident weight/bias, and the f32 post-matmul intermediates.  If the budget
    is tight, bm shrinks (we never declare a VMEM limit below the real need).
    """
    if m <= 128:
        return m
    usable = min(int(vmem_cap * 0.6), 80 << 20)          # ~38 MiB v7x, ~76 MiB v5e/v6e
    resident = _WEIGHT_BUFFERS * (h + 1) * (2 * z) * in_isz
    avail = max(usable - resident - (1 << 20), 2 << 20)
    per_row = 2 * (h * in_isz                            # x block (double-buffered)
                   + (z * in_isz if has_noise else 0)    # noise block
                   + 3 * z * out_isz)                    # z + vec output blocks
    per_row += 4 * (2 * z) * 4                           # f32 vec + mu/var/z temporaries
    bm = avail // per_row
    bm = max(128, min((bm // 128) * 128, 2048))          # 128-granular (v5e MXU), bounded
    if m >= 256:
        # At least two row blocks: DMA/compute overlap + both v7x TCs take work.
        half = max(128, (((m + 1) // 2) // 128) * 128)
        bm = min(bm, half)
    return min(bm, m)


# --------------------------------------------------------------------------- #
# Wrapper
# --------------------------------------------------------------------------- #
@functools.partial(jax.jit, static_argnames=("sampling", "block_m"))
def _forward_impl(x, weight_t, bias, noise, *, sampling, block_m):
    B, T, H = x.shape
    two_z = weight_t.shape[1]
    Z = two_z // 2
    M = B * T

    x2d = x.reshape(M, H)
    bias2d = bias.reshape(1, two_z)
    out_dtype = x.dtype

    in_isz = x.dtype.itemsize
    out_isz = in_isz
    has_noise = bool(sampling)
    vmem_cap = _tpu_vmem_capacity_bytes()
    bm = block_m if block_m is not None else _choose_block_m(
        M, H, Z, in_isz, out_isz, has_noise, vmem_cap)
    bm = min(bm, M)
    # Ragged last block is masked by Pallas -- no host-side pad / slice copies.
    grid = (pl.cdiv(M, bm),)

    # VMEM limit from the real buffer estimate: double-buffered streamed blocks,
    # resident (single-buffered) weight/bias, f32 intermediates, + headroom.
    streamed = 2 * bm * (H * in_isz + (Z * in_isz if has_noise else 0) + 3 * Z * out_isz)
    f32_tmp = 4 * bm * two_z * 4
    resident = _WEIGHT_BUFFERS * (H + 1) * two_z * weight_t.dtype.itemsize
    vmem_limit = int(1.25 * (streamed + f32_tmp + resident)) + (2 << 20)
    vmem_limit = min(max(vmem_limit, 16 << 20), int(vmem_cap * 0.8))

    cparams = pltpu.CompilerParams(
        dimension_semantics=("parallel",),
        vmem_limit_bytes=vmem_limit,
    )

    row = lambda i: (i, 0)      # noqa: E731
    rep = lambda i: (0, 0)      # noqa: E731
    w_spec = _invariant_spec((H, two_z), rep)
    b_spec = _invariant_spec((1, two_z), rep)

    if not sampling:
        mu2d, vec2d = pl.pallas_call(
            _vae_mu_kernel,
            out_shape=(jax.ShapeDtypeStruct((M, Z), out_dtype),
                       jax.ShapeDtypeStruct((M, two_z), out_dtype)),
            grid_spec=pltpu.PrefetchScalarGridSpec(
                num_scalar_prefetch=0, grid=grid,
                in_specs=[pl.BlockSpec((bm, H), row), w_spec, b_spec],
                out_specs=[pl.BlockSpec((bm, Z), row),
                           pl.BlockSpec((bm, two_z), row)]),
            compiler_params=cparams,
        )(x2d, weight_t, bias2d)
        out2d = mu2d
    else:
        noise2d = noise.reshape(M, Z)
        z2d, vec2d = pl.pallas_call(
            _vae_sample_kernel,
            out_shape=(jax.ShapeDtypeStruct((M, Z), out_dtype),
                       jax.ShapeDtypeStruct((M, two_z), out_dtype)),
            grid_spec=pltpu.PrefetchScalarGridSpec(
                num_scalar_prefetch=0, grid=grid,
                in_specs=[pl.BlockSpec((bm, H), row), w_spec, b_spec,
                          pl.BlockSpec((bm, Z), row)],
                out_specs=[pl.BlockSpec((bm, Z), row),
                           pl.BlockSpec((bm, two_z), row)]),
            compiler_params=cparams,
        )(x2d, weight_t, bias2d, noise2d)
        out2d = z2d

    # Exact-shape outputs: these reshapes are free (no copy).
    return out2d.reshape(B, T, Z), vec2d.reshape(B, T, two_z)


def vae_bottleneck_forward(x, weight_t, bias, noise=None, rng_key=None, *,
                           sampling=True, block_m=None):
    """VAEBottleneck.forward (residual_q=None).

    x:[B,T,H], weight_t:[H,2Z] (= nn.Linear(hidden, 2*z).weight.T), bias:[2Z].
    Returns (z if sampling else mu, vec) with shapes [B,T,Z] / [B,T,2Z].
    If sampling and `noise` is None, standard-normal noise is drawn with
    jax.random (matching `noise.normal_()` in the PyTorch module).
    """
    if sampling and noise is None:
        key = rng_key if rng_key is not None else jax.random.PRNGKey(0)
        Z = weight_t.shape[1] // 2
        noise = jax.random.normal(key, x.shape[:-1] + (Z,), jnp.float32).astype(x.dtype)
    return _forward_impl(x, weight_t, bias, noise if sampling else None,
                         sampling=sampling, block_m=block_m)


# --------------------------------------------------------------------------- #
# Pure-JAX reference
# --------------------------------------------------------------------------- #
def _reference(x, weight_t, bias, noise=None, sampling=True):
    xf = x.astype(jnp.float32)
    wf = weight_t.astype(jnp.float32)
    vec = jnp.einsum("bth,hz->btz", xf, wf) + bias.astype(jnp.float32)
    Z = weight_t.shape[1] // 2
    mu = vec[:, :, :Z]
    if not sampling:
        return mu, vec
    var = jax.nn.softplus(vec[:, :, Z:])
    return mu + noise.astype(jnp.float32) * var, vec


if __name__ == "__main__":
    # ---- Test 1: module-default small shapes, f32, exact check -------------
    B, T, H = 2, 8, 32
    Z = H  # z_size defaults to hidden_size
    k1, k2, k3, k4 = jax.random.split(jax.random.PRNGKey(0), 4)
    x = jax.random.normal(k1, (B, T, H), jnp.float32)
    weight = jax.random.normal(k2, (2 * Z, H), jnp.float32) * 0.05  # nn.Linear [2Z, H]
    weight_t = weight.T                                              # [H, 2Z]
    bias = jax.random.normal(k3, (2 * Z,), jnp.float32) * 0.05
    noise = jax.random.normal(k4, (B, T, Z), jnp.float32)

    z, vec = vae_bottleneck_forward(x, weight_t, bias, noise=noise, sampling=True)
    jax.block_until_ready((z, vec))
    z_ref, vec_ref = _reference(x, weight_t, bias, noise, sampling=True)
    assert z.shape == (B, T, Z) and vec.shape == (B, T, 2 * Z)
    assert jnp.allclose(z, z_ref, atol=1e-4, rtol=1e-4)
    assert jnp.allclose(vec, vec_ref, atol=1e-4, rtol=1e-4)

    mu, vec2 = vae_bottleneck_forward(x, weight_t, bias, sampling=False)
    jax.block_until_ready((mu, vec2))
    assert jnp.allclose(mu, vec_ref[:, :, :Z], atol=1e-4, rtol=1e-4)
    assert jnp.allclose(vec2, vec_ref, atol=1e-4, rtol=1e-4)

    # ---- Test 2: tiled multi-block grid, bf16 fed straight to the MXU ------
    B2, T2, H2, Z2 = 2, 512, 256, 128       # M = 1024, block_m=256 -> 4 grid steps
    k5, k6, k7, k8 = jax.random.split(jax.random.PRNGKey(1), 4)
    x2 = jax.random.normal(k5, (B2, T2, H2), jnp.float32).astype(jnp.bfloat16)
    w2 = (jax.random.normal(k6, (H2, 2 * Z2), jnp.float32) * 0.05).astype(jnp.bfloat16)
    b2 = (jax.random.normal(k7, (2 * Z2,), jnp.float32) * 0.05).astype(jnp.bfloat16)
    n2 = jax.random.normal(k8, (B2, T2, Z2), jnp.float32).astype(jnp.bfloat16)

    z2, v2 = vae_bottleneck_forward(x2, w2, b2, noise=n2, sampling=True, block_m=256)
    jax.block_until_ready((z2, v2))
    z2_ref, v2_ref = _reference(x2, w2, b2, n2, sampling=True)
    assert jnp.allclose(z2.astype(jnp.float32), z2_ref, atol=5e-2, rtol=5e-2)
    assert jnp.allclose(v2.astype(jnp.float32), v2_ref, atol=5e-2, rtol=5e-2)

    # ---- Test 3: ragged last block (no host padding) + wrapper-drawn noise --
    B3, T3, H3 = 2, 7, 32        # M = 14, block_m = 8 -> second block is ragged
    Z3 = H3
    k9, k10, k11 = jax.random.split(jax.random.PRNGKey(2), 3)
    x3 = jax.random.normal(k9, (B3, T3, H3), jnp.float32)
    w3 = jax.random.normal(k10, (H3, 2 * Z3), jnp.float32) * 0.05
    b3 = jax.random.normal(k11, (2 * Z3,), jnp.float32) * 0.05
    key3 = jax.random.PRNGKey(42)
    z3, v3 = vae_bottleneck_forward(x3, w3, b3, rng_key=key3, sampling=True, block_m=8)
    jax.block_until_ready((z3, v3))
    n3 = jax.random.normal(key3, (B3, T3, Z3), jnp.float32).astype(x3.dtype)
    z3_ref, v3_ref = _reference(x3, w3, b3, n3, sampling=True)
    assert jnp.allclose(z3, z3_ref, atol=1e-4, rtol=1e-4)
    assert jnp.allclose(v3, v3_ref, atol=1e-4, rtol=1e-4)

    print("KERNEL_OK")
</pallas_src>

<mosaic_0001>
module attributes {stable_mosaic.version = 11 : i64} {
  func.func @_vae_sample_kernel(%arg0: i32, %arg1: memref<16x32xf32, #tpu.memory_space<vmem>>, %arg2: memref<32x64xf32, #tpu.memory_space<vmem>>, %arg3: memref<1x64xf32, #tpu.memory_space<vmem>>, %arg4: memref<16x32xf32, #tpu.memory_space<vmem>>, %arg5: memref<16x32xf32, #tpu.memory_space<vmem>>, %arg6: memref<16x64xf32, #tpu.memory_space<vmem>>) attributes {dimension_semantics = [#tpu.dimension_semantics<parallel>], iteration_bounds = array<i64: 1>, scalar_prefetch = 0 : i64, scratch_operands = 0 : i64, tpu.core_type = #tpu.core_type<tc>, window_params = [{transform_indices = @transform_0, window_bounds = array<i64: 16, 32>}, {pipeline_mode = #tpu.pipeline_mode<synchronous>, transform_indices = @transform_1, window_bounds = array<i64: 32, 64>}, {pipeline_mode = #tpu.pipeline_mode<synchronous>, transform_indices = @transform_2, window_bounds = array<i64: 1, 64>}, {transform_indices = @transform_3, window_bounds = array<i64: 16, 32>}, {transform_indices = @transform_4, window_bounds = array<i64: 16, 32>}, {transform_indices = @transform_5, window_bounds = array<i64: 16, 64>}]} {
    %c0 = arith.constant 0 : index
    %c0_0 = arith.constant 0 : index
    %0 = vector.load %arg1[%c0, %c0_0] : memref<16x32xf32, #tpu.memory_space<vmem>>, vector<16x32xf32>
    %c0_1 = arith.constant 0 : index
    %c0_2 = arith.constant 0 : index
    %1 = vector.load %arg2[%c0_1, %c0_2] : memref<32x64xf32, #tpu.memory_space<vmem>>, vector<32x64xf32>
    %cst = arith.constant dense<0.000000e+00> : vector<16x64xf32>
    %2 = tpu.matmul %0, %1, %cst {dimension_numbers = #tpu.dot_dimension_numbers<[1], [0], [0], [1], [0, 0, 1, 1], [], []>} : vector<16x32xf32>, vector<32x64xf32>, vector<16x64xf32> -> vector<16x64xf32>
    %c0_3 = arith.constant 0 : index
    %c0_4 = arith.constant 0 : index
    %3 = vector.load %arg3[%c0_3, %c0_4] : memref<1x64xf32, #tpu.memory_space<vmem>>, vector<1x64xf32>
    %4 = vector.broadcast %3 : vector<1x64xf32> to vector<16x64xf32>
    %5 = arith.addf %2, %4 : vector<16x64xf32>
    %c0_5 = arith.constant 0 : index
    %c0_6 = arith.constant 0 : index
    %6 = vector.load %arg6[%c0_5, %c0_6] : memref<16x64xf32, #tpu.memory_space<vmem>>, vector<16x64xf32>
    tpu.vector_store %arg6[%c0_5, %c0_6], %5 {strides = array<i32>} : memref<16x64xf32, #tpu.memory_space<vmem>>, vector<16x64xf32>,
    %7 = vector.extract_strided_slice %5 {offsets = [0, 0], sizes = [16, 32], strides = [1, 1]} : vector<16x64xf32> to vector<16x32xf32>
    %8 = vector.extract_strided_slice %5 {offsets = [0, 32], sizes = [16, 32], strides = [1, 1]} : vector<16x64xf32> to vector<16x32xf32>
    %cst_7 = arith.constant 0.000000e+00 : f32
    %9 = vector.broadcast %cst_7 : f32 to vector<16x32xf32>
    %10 = arith.maximumf %8, %9 : vector<16x32xf32>
    %11 = math.absf %8 : vector<16x32xf32>
    %cst_8 = arith.constant 0.000000e+00 : f32
    %12 = vector.broadcast %cst_8 : f32 to vector<16x32xf32>
    %13 = arith.subf %12, %11 : vector<16x32xf32>
    %14 = math.exp %13 : vector<16x32xf32>
    %15 = math.log1p %14 : vector<16x32xf32>
    %16 = arith.addf %10, %15 : vector<16x32xf32>
    %c0_9 = arith.constant 0 : index
    %c0_10 = arith.constant 0 : index
    %17 = vector.load %arg4[%c0_9, %c0_10] : memref<16x32xf32, #tpu.memory_space<vmem>>, vector<16x32xf32>
    %18 = arith.mulf %17, %16 : vector<16x32xf32>
    %19 = arith.addf %7, %18 : vector<16x32xf32>
    %c0_11 = arith.constant 0 : index
    %c0_12 = arith.constant 0 : index
    %20 = vector.load %arg5[%c0_11, %c0_12] : memref<16x32xf32, #tpu.memory_space<vmem>>, vector<16x32xf32>
    tpu.vector_store %arg5[%c0_11, %c0_12], %19 {strides = array<i32>} : memref<16x32xf32, #tpu.memory_space<vmem>>, vector<16x32xf32>,
    return
  }
  func.func @transform_0(%arg0: i32) -> (i32, i32) {
    %c0_i32 = arith.constant 0 : i32
    %c0_i32_0 = arith.constant 0 : i32
    return %arg0, %c0_i32 : i32, i32
  }
  func.func @transform_1(%arg0: i32) -> (i32, i32) {
    %c0_i32 = arith.constant 0 : i32
    %c0_i32_0 = arith.constant 0 : i32
    %c0_i32_1 = arith.constant 0 : i32
    return %c0_i32, %c0_i32_0 : i32, i32
  }
  func.func @transform_2(%arg0: i32) -> (i32, i32) {
    %c0_i32 = arith.constant 0 : i32
    %c0_i32_0 = arith.constant 0 : i32
    %c0_i32_1 = arith.constant 0 : i32
    return %c0_i32, %c0_i32_0 : i32, i32
  }
  func.func @transform_3(%arg0: i32) -> (i32, i32) {
    %c0_i32 = arith.constant 0 : i32
    %c0_i32_0 = arith.constant 0 : i32
    return %arg0, %c0_i32 : i32, i32
  }
  func.func @transform_4(%arg0: i32) -> (i32, i32) {
    %c0_i32 = arith.constant 0 : i32
    %c0_i32_0 = arith.constant 0 : i32
    return %arg0, %c0_i32 : i32, i32
  }
  func.func @transform_5(%arg0: i32) -> (i32, i32) {
    %c0_i32 = arith.constant 0 : i32
    %c0_i32_0 = arith.constant 0 : i32
    return %arg0, %c0_i32 : i32, i32
  }
}

</mosaic_0001>

<bundles_post_ra>
// kernel: _forward_impl.1
= control target key start
LH: loop header
LB: loop body
LE: loop exit
PB: predicated region body
PF: predicated region fallthrough
CT: control target
= control target key end

     0   :  { %11 = vsyncpa [#allocation3], 0  ;;  %s421_s0 = inlined_call_operand.hbm [shape: f32[16,32], index: 0, kind: input, shape index: {}]   ;;  %s422_s1 = inlined_call_operand.hbm [shape: f32[32,64], index: 1, kind: input, shape index: {}]   ;;  %s423_s2 = inlined_call_operand.vmem [shape: f32[1,64], index: 2, kind: input, shape index: {}]   ;;  %s424_s3 = inlined_call_operand.hbm [shape: f32[16,32], index: 3, kind: input, shape index: {}]   ;;  %s425_s4 = inlined_call_operand.hbm [shape: f32[16,32], index: 4, kind: output, shape index: {0}]   ;;  %s426_s5 = inlined_call_operand.hbm [shape: f32[16,64], index: 5, kind: output, shape index: {1}]  }
   0x1   :  { %12 = vsyncpa [#allocation6], 0 }
   0x2   :  { %13 = vsyncpa [#allocation4], 0 }
   0x3   :  { %14 = vsyncpa [#allocation10], 0  ;;  %s32_s20 = sshll.u32 %s422_s1, 4  ;;  %s346_s21 = smov [#allocation5]   ;;  %s33_s20 = int_to_ptr.hbm [resolvable:$true] %s32_s20 }
   0x4   :  { %s34_s22 = sshll.u32 %s346_s21, 4  ;;  %s19_s25 = sshll.u32 %s421_s0, 4  ;;  %s35_s22 = int_to_ptr.vmem [resolvable:$true] %s34_s22  ;;  %s20_s25 = int_to_ptr.hbm [resolvable:$true] %s19_s25 }
   0x5   :  { %s347_s26 = smov 128   ;;  %s348_s27 = smov 8  }
   0x6   :  { %40 = dma.hbm_to_vmem [thread:$0]  %s33_s20, 512, %s35_s22, [#allocation6], %s347_s26, %s347_s26, %s348_s27  }
   0x7   :  { %s349_s28 = smov [#allocation2]   ;;  %s47_s1 = sshll.u32 %s424_s3, 4  ;;  %s48_s1 = int_to_ptr.hbm [resolvable:$true] %s47_s1 }
   0x8   :  { %s21_s29 = sshll.u32 %s349_s28, 4  ;;  %s350_s0 = smov [#allocation7]   ;;  %s22_s29 = int_to_ptr.vmem [resolvable:$true] %s21_s29 }
   0x9   :  { %27 = dma.hbm_to_vmem [thread:$0]  %s20_s25, 256, %s22_s29, [#allocation3], %s347_s26, %s347_s26, %s348_s27  }
   0xa   :  { %s49_s7 = sshll.u32 %s350_s0, 4  ;;  %s50_s7 = int_to_ptr.vmem [resolvable:$true] %s49_s7 }
   0xb   :  { %55 = dma.hbm_to_vmem [thread:$0]  %s48_s1, 256, %s50_s7, [#allocation6], %s347_s26, %s347_s26, %s348_s27  }
   0xc   :  { %338 = dma.done.wait [#allocation3], 256  }
   0xd   :  { %339 = vsyncadd [#allocation3], 4294967040 }
   0xe   :  { %340 = dma.done.wait [#allocation6], 768  }
   0xf   :  { %341 = vsyncadd [#allocation6], 4294966528  ;;  %v73_v0 = vld [vmem:[#allocation5 + $0x18] sm:$0xff]  ;;  %v72_v1 = vld [vmem:[#allocation5 + $0x10] sm:$0xff]  ;;  %vm78_vm0 = vcmask 261120   ;;  %vm108_vm1 = vcmask 523264  }
  0x10   :  { %97 = vmatpush.msra.mxu0 %v73_v0  ;;  %197 = vmatpush.msra.mxu1 %v73_v0  ;;  %v71_v2 = vld [vmem:[#allocation5 + $0x8] sm:$0xff]  ;;  %v70_v3 = vld [vmem:[#allocation5] sm:$0xff]  ;;  %v68_v4 = vld [vmem:[#allocation2] sm:$0xff]  ;;  %s352_s9 = smov [#allocation9]   ;;  %s176_s13 = sshll.u32 %s426_s5, 4  ;;  %s177_s13 = int_to_ptr.hbm [resolvable:$true] %s176_s13 }
  0x11   :  { %v69_v5 = vld [vmem:[#allocation2 + $0x8] sm:$0xff]  ;;  %v209_v6 = vld [vmem:[%s423_s2] ss:$0 sm:$0xff]  ;;  %s351_s2 = smov 96   ;;  %s174_s10 = sshll.u32 %s352_s9, 4  ;;  %v141_v39 = vld [vmem:[#allocation7] sm:$0xff]  ;;  %s175_s10 = int_to_ptr.vmem [resolvable:$true] %s174_s10 }
  0x12   :  { %98 = vmatpush.msra.mxu0 %v72_v1  ;;  %198 = vmatpush.msra.mxu1 %v72_v1  ;;  %v142_v43 = vld [vmem:[#allocation7 + $0x8] sm:$0xff]  ;;  %s353_s14 = smov [#allocation8]   ;;  %s163_s17 = sshll.u32 %s425_s4, 4  ;;  %s164_s17 = int_to_ptr.hbm [resolvable:$true] %s163_s17 }
  0x13   :  { %s161_s5 = sshll.u32 %s353_s14, 4  ;;  %s162_s5 = int_to_ptr.vmem [resolvable:$true] %s161_s5 }
  0x14   :  { %99 = vmatpush.msra.mxu0 %v71_v2  ;;  %199 = vmatpush.msra.mxu1 %v71_v2 }
  0x16   :  { %100 = vmatpush.msra.mxu0 %v70_v3  ;;  %200 = vmatpush.msra.mxu1 %v70_v3 }
  0x17   :  { %195 = vmatmul.msk.f32.vlgmr.msra.gmra.mxu0 %vm78_vm0, %v68_v4  ;;  %196 = vmatmul.msk.f32.vlgmr.msra.gmra.mxu1 %vm78_vm0, %v69_v5 }
  0x94   :  { %v102_v7 = vpop.f32.mrf.mxu0  ;;  %v105_v8 = vpop.f32.mrf.mxu1 }
  0x95   :  { %v103_v9 = vadd.f32 %v209_v6, %v102_v7  ;;  %v106_v10 = vadd.f32 %v209_v6, %v105_v8 }
  0x97   :  { %v113_v11 = vand.u32 2147483647, %v103_v9  ;;  %v114_v12 = vand.u32 2147483647, %v106_v10  ;;  %109 = vst.msk [vmem:[#allocation9] sm:$0xff] %vm108_vm1, %v103_v9  ;;  %v111_v30 = vmax.f32 %v103_v9, 0.0 }
  0x98   :  { %110 = vst.msk [vmem:[#allocation9 + $0x8] sm:$0xff] %vm108_vm1, %v106_v10  ;;  %v112_v37 = vmax.f32 %v106_v10, 0.0 }
  0x99   :  { %v115_v13 = vsub.f32 0.0, %v113_v11  ;;  %v116_v14 = vsub.f32 0.0, %v114_v12  ;;  %182 = dma.vmem_to_hbm [thread:$0]  %s175_s10, 256, %s177_s13, [#allocation10], %s347_s26, %s347_s26, %s348_s27  }
  0x9b   :  { %v117_v15 = vmul.f32 1.442695, %v115_v13  ;;  %v119_v16 = vmul.f32 1.442695, %v116_v14 }
  0x9d   :  { %210 = vpow2.f32 %v117_v15 }
  0x9e   :  { %212 = vpow2.f32 %v119_v16 }
  0xa3   :  { %v211_v17 = vpop.eup %210 }
  0xa4   :  { %v213_v18 = vpop.eup %212  ;;  %v121_v19 = vadd.f32 1.0, %v211_v17  ;;  %v124_v20 = vmul.f32 -0.5, %v211_v17  ;;  %v127_v24 = vand.u32 2147483647, %v211_v17 }
  0xa5   :  { %v130_v21 = vadd.f32 1.0, %v213_v18  ;;  %v133_v23 = vmul.f32 -0.5, %v213_v18  ;;  %v136_v31 = vand.u32 2147483647, %v213_v18 }
  0xa6   :  { %214 = vlog2.f32 %v121_v19  ;;  %v125_v22 = vadd.f32 1.0, %v124_v20  ;;  %vm128_vm2 = vcmp.lt.f32.partialorder %v127_v24, 0.0004427343 }
  0xa7   :  { %216 = vlog2.f32 %v130_v21  ;;  %v134_v28 = vadd.f32 1.0, %v133_v23  ;;  %vm137_vm3 = vcmp.lt.f32.partialorder %v136_v31, 0.0004427343 }
  0xa8   :  { %v126_v27 = vmul.f32 %v211_v17, %v125_v22 }
  0xa9   :  { %v135_v35 = vmul.f32 %v213_v18, %v134_v28 }
  0xac   :  { %v215_v25 = vpop.eup %214 }
  0xad   :  { %v123_v26 = vmul.f32 0.6931472, %v215_v25  ;;  %v217_v29 = vpop.eup %216 }
  0xae   :  { %v132_v34 = vmul.f32 0.6931472, %v217_v29 }
  0xaf   :  { %v129_v32 = vsel %vm128_vm2, %v126_v27, %v123_v26 }
  0xb0   :  { %v139_v33 = vadd.f32 %v129_v32, %v111_v30  ;;  %v138_v36 = vsel %vm137_vm3, %v135_v35, %v132_v34 }
  0xb1   :  { %v140_v38 = vadd.f32 %v138_v36, %v112_v37 }
  0xb2   :  { %145 = vrot.lane.b32.xlu0 %v139_v33, %s351_s2 }
  0xba   :  { %147 = vrot.lane.b32.xlu0 %v140_v38, %s351_s2 }
 0x124   :  { %v146_v40 = vpop.permute.xlu0 %145 }
 0x125   :  { %v151_v41 = vmul.f32 %v146_v40, %v141_v39 }
 0x127   :  { %v153_v42 = vadd.f32 %v151_v41, %v103_v9 }
 0x129   :  { %155 = vst.msk [vmem:[#allocation8] sm:$0xff] %vm78_vm0, %v153_v42 }
 0x12c   :  { %v148_v44 = vpop.permute.xlu0 %147 }
 0x12d   :  { %v152_v45 = vmul.f32 %v148_v44, %v142_v43 }
 0x12f   :  { %v154_v46 = vadd.f32 %v152_v45, %v106_v10 }
 0x131   :  { %156 = vst.msk [vmem:[#allocation8 + $0x8] sm:$0xff] %vm78_vm0, %v154_v46 }
 0x132   :  { %169 = dma.vmem_to_hbm [thread:$0]  %s162_s5, 256, %s164_s17, [#allocation4], %s347_s26, %s347_s26, %s348_s27  }
 0x133   :  { %342 = dma.done.wait [#allocation4], 256  }
 0x134   :  { %343 = vsyncadd [#allocation4], 4294967040 }
 0x135   :  { %344 = dma.done.wait [#allocation10], 256  }
 0x136   :  { %345 = vsyncadd [#allocation10], 4294967040 }
 0x137   :  { %191 = vsyncpa [#allocation3], 1 }
 0x138   :  { %192 = vsyncpa [#allocation6], 1 }
 0x139   :  { %193 = vsyncpa [#allocation4], 1 }
 0x13a   :  { %194 = vsyncpa [#allocation10], 1 }

</bundles_post_ra>
